<compile_context>
chip_gen: v7x
topology: tpu7x:2x2x1
jax: 0.10.0
libtpu: 0.0.40
codegen_flags: <defaults>
</compile_context>

<pallas_src>
import jax
import jax.numpy as jnp
from jax.experimental import pallas as pl
from jax.experimental.pallas import tpu as pltpu

LANES = 128           # lane width: keep the last block dim a multiple of 128
MAX_BLOCK_ROWS = 512  # 512x128 f32 = 256 KiB/tile; safe for v7x 64 MiB VMEM


def logreg_kernel(w_ref, b_ref, x_ref, o_ref):
    # w_ref (1,1) and b_ref (1,) live in SMEM; x_ref/o_ref are lane-dense
    # (block_rows, 128) VMEM tiles. Linear(1,1) degenerates to an elementwise
    # scale-and-shift (VPU) followed by the logistic link (EUP).
    w = w_ref[0, 0]
    b = b_ref[0]
    z = x_ref[...] * w + b
    o_ref[...] = jax.nn.sigmoid(z)


def logistic_regression(x, weight, bias):
    """x: [N, 1] f32, weight: [1, 1] f32, bias: [1] f32 -> [N, 1] f32."""
    n = x.shape[0]

    # ---- lane-dense reshape: [N, 1] -> [rows_padded, 128] -----------------
    rows = pl.cdiv(n, LANES)
    block_rows = min(MAX_BLOCK_ROWS, rows)
    rows_padded = pl.cdiv(rows, block_rows) * block_rows
    padded_n = rows_padded * LANES

    x_flat = x.reshape(-1).astype(jnp.float32)
    x_flat = jnp.pad(x_flat, (0, padded_n - n))
    x2d = x_flat.reshape(rows_padded, LANES)

    grid = (rows_padded // block_rows,)

    out2d = pl.pallas_call(
        logreg_kernel,
        out_shape=jax.ShapeDtypeStruct((rows_padded, LANES), jnp.float32),
        grid_spec=pltpu.PrefetchScalarGridSpec(
            num_scalar_prefetch=0,
            grid=grid,
            in_specs=[
                pl.BlockSpec(memory_space=pltpu.SMEM),                 # weight (1,1)
                pl.BlockSpec(memory_space=pltpu.SMEM),                 # bias   (1,)
                pl.BlockSpec((block_rows, LANES), lambda i: (i, 0)),   # x tile
            ],
            out_specs=pl.BlockSpec((block_rows, LANES), lambda i: (i, 0)),
        ),
        compiler_params=pltpu.CompilerParams(
            dimension_semantics=("parallel",)),   # lets v7x use both TCs
    )(weight, bias, x2d)

    # Drop padded tail (it holds sigmoid(b) garbage) and restore [N, 1].
    return out2d.reshape(-1)[:n].reshape(n, 1)


if __name__ == "__main__":
    # Deterministic parameter init (matches nn.Linear(1,1): U(-1, 1) bound).
    key = jax.random.PRNGKey(0)
    kw, kb = jax.random.split(key)
    weight = jax.random.uniform(kw, (1, 1), jnp.float32, minval=-1.0, maxval=1.0)
    bias = jax.random.uniform(kb, (1,), jnp.float32, minval=-1.0, maxval=1.0)

    # Input mirrors the script's np.linspace(0, 10, 200), shaped [N, 1].
    x = jnp.linspace(0.0, 10.0, 200, dtype=jnp.float32).reshape(200, 1)

    y = logistic_regression(x, weight, bias)
    jax.block_until_ready(y)

    # Cross-check against plain JAX reference.
    y_ref = jax.nn.sigmoid(x @ weight.T + bias)
    assert y.shape == (200, 1)
    assert jnp.allclose(y, y_ref, atol=1e-6), "mismatch vs reference"
    print("KERNEL_OK")
</pallas_src>

<mosaic_0001>
module attributes {stable_mosaic.version = 11 : i64} {
  func.func @logreg_kernel(%arg0: i32, %arg1: memref<1x1xf32, #tpu.memory_space<smem>>, %arg2: memref<1xf32, #tpu.memory_space<smem>>, %arg3: memref<2x128xf32, #tpu.memory_space<vmem>>, %arg4: memref<2x128xf32, #tpu.memory_space<vmem>>) attributes {dimension_semantics = [#tpu.dimension_semantics<parallel>], iteration_bounds = array<i64: 1>, scalar_prefetch = 0 : i64, scratch_operands = 0 : i64, tpu.core_type = #tpu.core_type<tc>, window_params = [{transform_indices = @transform_0, window_bounds = array<i64: 1, 1>}, {transform_indices = @transform_1, window_bounds = array<i64: 1>}, {transform_indices = @transform_2, window_bounds = array<i64: 2, 128>}, {transform_indices = @transform_3, window_bounds = array<i64: 2, 128>}]} {
    %c0 = arith.constant 0 : index
    %c0_0 = arith.constant 0 : index
    %0 = memref.load %arg1[%c0, %c0_0] : memref<1x1xf32, #tpu.memory_space<smem>>
    %c0_1 = arith.constant 0 : index
    %1 = memref.load %arg2[%c0_1] : memref<1xf32, #tpu.memory_space<smem>>
    %c0_2 = arith.constant 0 : index
    %c0_3 = arith.constant 0 : index
    %2 = vector.load %arg3[%c0_2, %c0_3] : memref<2x128xf32, #tpu.memory_space<vmem>>, vector<2x128xf32>
    %3 = vector.broadcast %0 : f32 to vector<2x128xf32>
    %4 = arith.mulf %2, %3 : vector<2x128xf32>
    %5 = vector.broadcast %1 : f32 to vector<2x128xf32>
    %6 = arith.addf %4, %5 : vector<2x128xf32>
    %7 = arith.negf %6 : vector<2x128xf32>
    %8 = math.exp %7 : vector<2x128xf32>
    %cst = arith.constant 1.000000e+00 : f32
    %9 = vector.broadcast %cst : f32 to vector<2x128xf32>
    %10 = arith.addf %9, %8 : vector<2x128xf32>
    %11 = arith.divf %9, %10 : vector<2x128xf32>
    %c0_4 = arith.constant 0 : index
    %c0_5 = arith.constant 0 : index
    %12 = vector.load %arg4[%c0_4, %c0_5] : memref<2x128xf32, #tpu.memory_space<vmem>>, vector<2x128xf32>
    tpu.vector_store %arg4[%c0_4, %c0_5], %11 {strides = array<i32>} : memref<2x128xf32, #tpu.memory_space<vmem>>, vector<2x128xf32>,
    return
  }
  func.func @transform_0(%arg0: i32) -> (i32, i32) {
    %c0_i32 = arith.constant 0 : i32
    %c0_i32_0 = arith.constant 0 : i32
    %c0_i32_1 = arith.constant 0 : i32
    return %c0_i32, %c0_i32_0 : i32, i32
  }
  func.func @transform_1(%arg0: i32) -> i32 {
    %c0_i32 = arith.constant 0 : i32
    %c0_i32_0 = arith.constant 0 : i32
    return %c0_i32 : i32
  }
  func.func @transform_2(%arg0: i32) -> (i32, i32) {
    %c0_i32 = arith.constant 0 : i32
    %c0_i32_0 = arith.constant 0 : i32
    return %arg0, %c0_i32 : i32, i32
  }
  func.func @transform_3(%arg0: i32) -> (i32, i32) {
    %c0_i32 = arith.constant 0 : i32
    %c0_i32_0 = arith.constant 0 : i32
    return %arg0, %c0_i32 : i32, i32
  }
}

</mosaic_0001>

<bundles_post_ra>
// kernel: tpu_custom_call.1
= control target key start
LH: loop header
LB: loop body
LE: loop exit
PB: predicated region body
PF: predicated region fallthrough
CT: control target
= control target key end

     0   :  { %s117_s0 = inlined_call_operand.<no memory space> [shape: f32[1,1], index: 0, kind: input, shape index: {}]   ;;  %s118_s1 = inlined_call_operand.<no memory space> [shape: f32[1], index: 1, kind: input, shape index: {}]   ;;  %s119_s2 = inlined_call_operand.vmem [shape: f32[2,128], index: 2, kind: input, shape index: {}]   ;;  %s120_s3 = inlined_call_operand.hbm [shape: f32[2,128], index: 3, kind: output, shape index: {}]  }
   0x1   :  { %v19_v0 = vld [vmem:[%s119_s2] sm:$0x3]  ;;  %v20_v1 = vstv %s117_s0  ;;  %v22_v2 = vstv %s118_s1 }
   0x2   :  { %10 = vsyncpa [#allocation5], 0  ;;  %v21_v3 = vmul.f32 %v20_v1, %v19_v0  ;;  %s75_s18 = smov [#allocation4]  }
   0x3   :  { %s37_s19 = sshll.u32 %s75_s18, 4  ;;  %s38_s19 = int_to_ptr.vmem [resolvable:$true] %s37_s19 }
   0x4   :  { %v23_v4 = vadd.f32 %v22_v2, %v21_v3  ;;  %s51_s2 = scalar_lea.vmem %s38_s19, 32  ;;  %p56_p1 = scmp.lt.s32.totalorder %s38_s19, %s38_s19 }
   0x5   :  { %p52_p0 = scmp.ne.s32.totalorder %s38_s19, %s51_s2  ;;  %p57_p2 = scmp.lt.s32.totalorder %s51_s2, %s51_s2 }
   0x6   :  { %v45_v5 = vmul.f32 -1.442695, %v23_v4 }
   0x7   :  { %p58_p3 = por %p57_p2, %p56_p1 }
   0x8   :  { %47 = vpow2.f32 %v45_v5 }
   0x9   :  { %p59_p4 = pnand %p58_p3, %p52_p0 }
  0x12   :  { %v48_v6 = vpop.eup %47 }
  0x13   :  { %v27_v7 = vadd.f32 1.0, %v48_v6 }
  0x15   :  { %49 = vrcp.f32 %v27_v7 }
  0x1f   :  { %v50_v8 = vpop.eup %49 }
  0x20   :  { %30 = vst [vmem:[#allocation4] sm:$0x3] %v50_v8 }
  0x21   :  { %62 = shalt.err (!%p59_p4)
}
  0x22   :  { %s63_s20 = scalar_lea.hbm %s120_s3, 32 }
  0x23   :  { %p64_p5 = scmp.ne.s32.totalorder %s120_s3, %s63_s20  ;;  %p67_p6 = scmp.lt.u32.totalorder %s63_s20, %s120_s3 }
  0x25   :  { %p69_p7 = pnand %p67_p6, %p64_p5 }
  0x27   :  { %72 = shalt.err (!%p69_p7)
}
  0x28   :  { %40 = dma.vmem_to_hbm [thread:$0]  %s38_s19, 32, %s120_s3, [#allocation5]  }
  0x29   :  { %73 = dma.done.wait [#allocation5], 32  }
  0x2a   :  { %74 = vsyncadd [#allocation5], 4294967264 }
  0x2b   :  { %44 = vsyncpa [#allocation5], 1 }

</bundles_post_ra>
